<compile_context>
chip_gen: v7x
topology: tpu7x:2x2x1
jax: 0.10.0
libtpu: 0.0.40
codegen_flags: <defaults>
</compile_context>

<pallas_src>
import math

import numpy as np
import jax
import jax.numpy as jnp
from jax.experimental import pallas as pl
from jax.experimental.pallas import tpu as pltpu


# ---------------------------------------------------------------------------
# Host-side (init-time) parameter folding — mirrors AntiAliasInterpolation2d.__init__
# ---------------------------------------------------------------------------
def _gaussian_1d(scale):
    """Normalized 1-D Gaussian; the PyTorch 2-D kernel equals outer(g, g)."""
    sigma = (1.0 / scale - 1.0) / 2.0
    ksize = 2 * round(sigma * 4) + 1
    ka = ksize // 2
    kb = ka - 1 if ksize % 2 == 0 else ka
    ax = np.arange(ksize, dtype=np.float64)
    mean = (ksize - 1) / 2.0
    g = np.exp(-((ax - mean) ** 2) / (2.0 * sigma ** 2))
    return g / g.sum(), ka, kb


def _conv_matrix(n, g, ka):
    """(n, n) matrix of the 1-D 'valid' correlation with ka zeros of padding
    folded in:  (C @ x)[i] == sum_k g[k] * xpad[i + k]."""
    K = g.shape[0]
    C = np.zeros((n, n), dtype=np.float64)
    for i in range(n):
        for k in range(K):
            j = i + k - ka
            if 0 <= j < n:
                C[i, j] += g[k]
    return C


def _bilinear_matrix(in_size, out_size):
    """1-D linear interpolation (align_corners=True) as an (out, in) matrix."""
    A = np.zeros((out_size, in_size), dtype=np.float64)
    if out_size == 1:
        A[0, 0] = 1.0
        return A
    ratio = (in_size - 1) / (out_size - 1)
    for i in range(out_size):
        src = i * ratio
        i0 = int(math.floor(src))
        i1 = min(i0 + 1, in_size - 1)
        w1 = src - i0
        A[i, i0] += 1.0 - w1
        A[i, i1] += w1
    return A


def make_folded_matrices(H, W, scale, dtype=jnp.bfloat16):
    """Fold pad + depthwise Gaussian blur + bilinear resize into
    out_plane = M_row @ x_plane @ M_col  (M_row: (Hout,H), M_col: (W,Wout))."""
    g, ka, kb = _gaussian_1d(scale)
    assert ka == kb  # kernel size is always odd here
    Hout = int(math.floor(H * scale))
    Wout = int(math.floor(W * scale))
    m_row = _bilinear_matrix(H, Hout) @ _conv_matrix(H, g, ka)        # (Hout, H)
    m_col = (_bilinear_matrix(W, Wout) @ _conv_matrix(W, g, ka)).T    # (W, Wout)
    return jnp.asarray(m_row, dtype=dtype), jnp.asarray(m_col, dtype=dtype)


# ---------------------------------------------------------------------------
# Pallas kernel: two batched MXU matmuls over a block of `bc` channel planes.
# ---------------------------------------------------------------------------
def _aa_resize_kernel(x_ref, m_row_ref, m_col_ref, o_ref):
    bc, h, w = x_ref.shape
    hout = m_row_ref.shape[0]
    wout = m_col_ref.shape[1]

    x = x_ref[...].astype(jnp.bfloat16)                               # (bc, h, w)

    # Column pass: blur + resize along W (batched matmul on the MXU).
    m_col = jnp.broadcast_to(m_col_ref[...][None], (bc, w, wout))
    t = jnp.einsum("bhw,bwv->bhv", x, m_col,
                   preferred_element_type=jnp.float32)                # (bc, h, wout)

    # Row pass: blur + resize along H.
    m_row = jnp.broadcast_to(m_row_ref[...][None], (bc, hout, h))
    out = jnp.einsum("boh,bhv->bov", m_row, t.astype(jnp.bfloat16),
                     preferred_element_type=jnp.float32)              # (bc, hout, wout)

    # Note: for Wout < 128 this store is lane-masked; kept as-is (safe layout)
    # since the output is already scale^2 smaller than the input traffic.
    o_ref[...] = out.astype(o_ref.dtype)


def _choose_channel_block(n, c, h, w, hout, wout, budget_bytes=24 * 1024 * 1024):
    """Largest divisor of C whose double-buffered f32 in+out tiles fit the
    VMEM budget; when N == 1 prefer leaving >= 2 grid steps (v7x has 2 TCs)."""
    per_plane = 2 * 4 * (h * w + hout * wout)   # double-buffered f32 in + out
    cap = max(1, budget_bytes // per_plane)
    divisors = [d for d in range(1, c + 1) if c % d == 0 and d <= cap]
    if n == 1:
        multi = [d for d in divisors if c // d >= 2]
        if multi:
            return max(multi)
    return max(divisors)


def anti_alias_interpolation2d(x, scale, m_row, m_col):
    """Forward pass of AntiAliasInterpolation2d. x: (N, C, H, W) float32."""
    if scale == 1.0:
        return x
    N, C, H, W = x.shape
    Hout = m_row.shape[0]
    Wout = m_col.shape[1]
    bc = _choose_channel_block(N, C, H, W, Hout, Wout)

    return pl.pallas_call(
        _aa_resize_kernel,
        out_shape=jax.ShapeDtypeStruct((N, C, Hout, Wout), x.dtype),
        grid_spec=pltpu.PrefetchScalarGridSpec(
            num_scalar_prefetch=0,
            grid=(N, C // bc),
            in_specs=[
                pl.BlockSpec((None, bc, H, W), lambda n, c: (n, c, 0, 0)),
                # Constant index_map -> matrices are DMA'd once and stay
                # resident in VMEM across all grid steps.
                pl.BlockSpec((Hout, H), lambda n, c: (0, 0)),
                pl.BlockSpec((W, Wout), lambda n, c: (0, 0)),
            ],
            out_specs=pl.BlockSpec((None, bc, Hout, Wout),
                                   lambda n, c: (n, c, 0, 0)),
        ),
        compiler_params=pltpu.CompilerParams(
            dimension_semantics=("parallel", "parallel"),
            vmem_limit_bytes=48 * 1024 * 1024),
    )(x, m_row, m_col)


# ---------------------------------------------------------------------------
# Independent float64 reference (literal pad + conv + bilinear), test only.
# ---------------------------------------------------------------------------
def reference_numpy(x, scale):
    if scale == 1.0:
        return x
    N, C, H, W = x.shape
    g, ka, kb = _gaussian_1d(scale)
    K = g.shape[0]
    kern = np.outer(g, g)                       # normalized 2-D Gaussian
    xp = np.pad(x, ((0, 0), (0, 0), (ka, kb), (ka, kb)))
    conv = np.zeros_like(x)
    for ky in range(K):
        for kx in range(K):
            conv += kern[ky, kx] * xp[:, :, ky:ky + H, kx:kx + W]
    Hout = int(math.floor(H * scale))
    Wout = int(math.floor(W * scale))
    A = _bilinear_matrix(H, Hout)
    B = _bilinear_matrix(W, Wout)
    return np.einsum("oh,nchw,vw->ncov", A, conv, B)


if __name__ == "__main__":
    key = jax.random.PRNGKey(0)
    N, C, H, W = 2, 4, 16, 16
    scale = 0.5  # -> sigma=0.5, kernel_size=5, output spatial 8x8

    x = jax.random.normal(key, (N, C, H, W), dtype=jnp.float32)
    m_row, m_col = make_folded_matrices(H, W, scale)

    out = anti_alias_interpolation2d(x, scale, m_row, m_col)
    out = jax.block_until_ready(out)

    expected_shape = (N, C, int(H * scale), int(W * scale))
    assert out.shape == expected_shape, (out.shape, expected_shape)

    ref = reference_numpy(np.asarray(x, dtype=np.float64), scale)
    # bf16 MXU operands (f32 accumulation) -> loosened tolerance vs f64 ref.
    np.testing.assert_allclose(np.asarray(out, dtype=np.float64), ref,
                               rtol=5e-2, atol=5e-2)

    print("KERNEL_OK")
</pallas_src>

<mosaic_0001>
module attributes {stable_mosaic.version = 11 : i64} {
  func.func @_aa_resize_kernel(%arg0: i32, %arg1: i32, %arg2: memref<1x4x16x16xf32, #tpu.memory_space<vmem>>, %arg3: memref<8x16xbf16, #tpu.memory_space<vmem>>, %arg4: memref<16x8xbf16, #tpu.memory_space<vmem>>, %arg5: memref<1x4x8x8xf32, #tpu.memory_space<vmem>>) attributes {dimension_semantics = [#tpu.dimension_semantics<parallel>, #tpu.dimension_semantics<parallel>], iteration_bounds = array<i64: 2, 1>, scalar_prefetch = 0 : i64, scratch_operands = 0 : i64, tpu.core_type = #tpu.core_type<tc>, window_params = [{transform_indices = @transform_0, window_bounds = array<i64: 1, 4, 16, 16>}, {pipeline_mode = #tpu.pipeline_mode<synchronous>, transform_indices = @transform_1, window_bounds = array<i64: 8, 16>}, {pipeline_mode = #tpu.pipeline_mode<synchronous>, transform_indices = @transform_2, window_bounds = array<i64: 16, 8>}, {transform_indices = @transform_3, window_bounds = array<i64: 1, 4, 8, 8>}]} {
    %c0 = arith.constant 0 : index
    %c0_0 = arith.constant 0 : index
    %c0_1 = arith.constant 0 : index
    %c0_2 = arith.constant 0 : index
    %0 = vector.load %arg2[%c0, %c0_0, %c0_1, %c0_2] : memref<1x4x16x16xf32, #tpu.memory_space<vmem>>, vector<1x4x16x16xf32>
    %1 = vector.shape_cast %0 : vector<1x4x16x16xf32> to vector<4x16x16xf32>
    %2 = arith.truncf %1 : vector<4x16x16xf32> to vector<4x16x16xbf16>
    %c0_3 = arith.constant 0 : index
    %c0_4 = arith.constant 0 : index
    %3 = vector.load %arg4[%c0_3, %c0_4] : memref<16x8xbf16, #tpu.memory_space<vmem>>, vector<16x8xbf16>
    %4 = vector.shape_cast %3 : vector<16x8xbf16> to vector<1x16x8xbf16>
    %5 = vector.shape_cast %4 : vector<1x16x8xbf16> to vector<1x16x8xbf16>
    %6 = vector.broadcast %5 : vector<1x16x8xbf16> to vector<4x16x8xbf16>
    "tpu.trace_start"() <{level = 10 : i32, message = "bhw,bwv->bhv"}> : () -> ()
    %cst = arith.constant dense<0.000000e+00> : vector<4x16x8xf32>
    %7 = tpu.matmul %2, %6, %cst {dimension_numbers = #tpu.dot_dimension_numbers<[2], [1], [1], [2], [0, 0, 0, 1, 1, 2], [0], [0]>} : vector<4x16x16xbf16>, vector<4x16x8xbf16>, vector<4x16x8xf32> -> vector<4x16x8xf32>
    "tpu.trace_stop"() : () -> ()
    %c0_5 = arith.constant 0 : index
    %c0_6 = arith.constant 0 : index
    %8 = vector.load %arg3[%c0_5, %c0_6] : memref<8x16xbf16, #tpu.memory_space<vmem>>, vector<8x16xbf16>
    %9 = vector.shape_cast %8 : vector<8x16xbf16> to vector<1x8x16xbf16>
    %10 = vector.shape_cast %9 : vector<1x8x16xbf16> to vector<1x8x16xbf16>
    %11 = vector.broadcast %10 : vector<1x8x16xbf16> to vector<4x8x16xbf16>
    %12 = arith.truncf %7 : vector<4x16x8xf32> to vector<4x16x8xbf16>
    "tpu.trace_start"() <{level = 10 : i32, message = "boh,bhv->bov"}> : () -> ()
    %cst_7 = arith.constant dense<0.000000e+00> : vector<4x8x8xf32>
    %13 = tpu.matmul %11, %12, %cst_7 {dimension_numbers = #tpu.dot_dimension_numbers<[2], [1], [1], [2], [0, 0, 0, 1, 1, 2], [0], [0]>} : vector<4x8x16xbf16>, vector<4x16x8xbf16>, vector<4x8x8xf32> -> vector<4x8x8xf32>
    "tpu.trace_stop"() : () -> ()
    %c0_8 = arith.constant 0 : index
    %c0_9 = arith.constant 0 : index
    %c0_10 = arith.constant 0 : index
    %c0_11 = arith.constant 0 : index
    %14 = vector.load %arg5[%c0_8, %c0_9, %c0_10, %c0_11] : memref<1x4x8x8xf32, #tpu.memory_space<vmem>>, vector<1x4x8x8xf32>
    %15 = vector.shape_cast %14 : vector<1x4x8x8xf32> to vector<4x8x8xf32>
    %16 = vector.shape_cast %13 : vector<4x8x8xf32> to vector<1x4x8x8xf32>
    tpu.vector_store %arg5[%c0_8, %c0_9, %c0_10, %c0_11], %16 {strides = array<i32>} : memref<1x4x8x8xf32, #tpu.memory_space<vmem>>, vector<1x4x8x8xf32>,
    return
  }
  func.func @transform_0(%arg0: i32, %arg1: i32) -> (i32, i32, i32, i32) {
    %c0_i32 = arith.constant 0 : i32
    %c0_i32_0 = arith.constant 0 : i32
    %c0_i32_1 = arith.constant 0 : i32
    return %arg0, %arg1, %c0_i32, %c0_i32_0 : i32, i32, i32, i32
  }
  func.func @transform_1(%arg0: i32, %arg1: i32) -> (i32, i32) {
    %c0_i32 = arith.constant 0 : i32
    %c0_i32_0 = arith.constant 0 : i32
    %c0_i32_1 = arith.constant 0 : i32
    return %c0_i32, %c0_i32_0 : i32, i32
  }
  func.func @transform_2(%arg0: i32, %arg1: i32) -> (i32, i32) {
    %c0_i32 = arith.constant 0 : i32
    %c0_i32_0 = arith.constant 0 : i32
    %c0_i32_1 = arith.constant 0 : i32
    return %c0_i32, %c0_i32_0 : i32, i32
  }
  func.func @transform_3(%arg0: i32, %arg1: i32) -> (i32, i32, i32, i32) {
    %c0_i32 = arith.constant 0 : i32
    %c0_i32_0 = arith.constant 0 : i32
    %c0_i32_1 = arith.constant 0 : i32
    return %arg0, %arg1, %c0_i32, %c0_i32_0 : i32, i32, i32, i32
  }
}

</mosaic_0001>

<bundles_post_ra>
// kernel: tpu_custom_call.1
= control target key start
LH: loop header
LB: loop body
LE: loop exit
PB: predicated region body
PF: predicated region fallthrough
CT: control target
= control target key end

     0   :  { %8 = vsyncpa [#allocation3], 0  ;;  %s1187_s0 = inlined_call_operand.hbm [shape: f32[2,4,16,16], index: 0, kind: input, shape index: {}]   ;;  %s1188_s1 = inlined_call_operand.vmem [shape: bf16[8,16], index: 1, kind: input, shape index: {}]   ;;  %s1189_s2 = inlined_call_operand.vmem [shape: bf16[16,8], index: 2, kind: input, shape index: {}]   ;;  %s1190_s3 = inlined_call_operand.hbm [shape: f32[2,4,8,8], index: 3, kind: output, shape index: {}]  }
   0x1   :  { %10 = vsyncpa [#allocation3 + $0x1], 0 }
   0x2   :  { %11 = vsyncpa [#allocation4], 0 }
   0x3   :  { %13 = vsyncpa [#allocation4 + $0x1], 0  ;;  %s985_s12 = smov 0   ;;  %s987_s13 = smov 0  }
   0x4   :  { %s989_s14 = smov 0   ;;  %s991_s15 = smov 0  }
   0x5   :  { %s993_s16 = smov 0   ;;  %s995_s17 = smov 0  }
   0x6 LB: > { %s684_s18 = sadd.s32 4294967295, %s955_s17   ;;  %s685_s19 = sadd.s32 4294967294, %s955_s17   ;;  %s955_s17 = sphi %s995_s17, %s19_s17   ;;  %s951_s16 = sphi %s993_s16, %s1205_s16   ;;  %s947_s15 = sphi %s991_s15, %s1204_s15   ;;  %s943_s14 = sphi %s989_s14, %s1203_s14   ;;  %s939_s13 = sphi %s987_s13, %s1202_s13   ;;  %s935_s12 = sphi %s985_s12, %s1201_s12  }
   0x7   : > { %s31_s20 = sadd.s32 1, %s951_s16  ;;  %s40_s21 = sadd.s32 1, %s943_s14 }
   0x8   : > { %p33_p0 = scmp.ge.s32.totalorder %s31_s20, 2  ;;  %p47_p1 = scmp.ne.s32.totalorder %s943_s14, %s939_s13 }
   0x9   : > { %p48_p2 = scmp.eq.s32.totalorder %s955_s17, 0  ;;  %p53_p3 = scmp.ne.s32.totalorder %s939_s13, %s935_s12 }
   0xa   : > { %s1207_s20 = smov (%p33_p0, %s31_s20), 0  ;;  %p54_p5 = scmp.eq.s32.totalorder %s684_s18, 0 }
   0xb   : > { %p1026_p4 = por %p48_p2, %p47_p1  ;;  %s35_s23 = ssub.s32 %s951_s16, %s1207_s20 }
   0xc   : > { %p121_p6 = scmp.eq.s32.totalorder %s684_s18, 1  ;;  %p38_p7 = scmp.eq.s32.totalorder %s35_s23, 0 }
   0xd   : > { %p1032_p8 = por %p54_p5, %p53_p3  ;;  %p127_p10 = scmp.eq.s32.totalorder %s685_s19, 1 }
   0xe   : > { %p1036_p9 = por %p121_p6, %p47_p1  ;;  %p786_p13 = scmp.lt.s32.totalorder %s955_s17, 2 }
   0xf   : > { %s1041_s26 = scalar_select %p38_p7, %s943_s14, %s40_s21  }
  0x10   : > { %s1194_s25 = scalar_select %p1036_p9, 1, 0 }
  0x11   : > { %p1043_p11 = por %p127_p10, %p53_p3  ;;  %s153_s28 = sand.u32 1, %s943_s14  }
  0x12   : > { %s688_s29 = sshll.u32 %s153_s28, 6  ;;  %s708_s30 = sshll.u32 %s951_s16, 10 }
  0x13   : > { %s1195_s27 = scalar_select %p1043_p11, 1, 0 }
  0x14   : > { %s1054_s6 = scalar_lea.hbm %s1187_s0, %s708_s30  ;;  %s157_s7 = scalar_lea.vmem [#allocation2], %s688_s29 }
  0x15   : > { %s167_s8 = sshll.u32 %s157_s7, 4  ;;  %p1060_p0 = pnand %p786_p13, %p1026_p4  ;;  %s1056_s8 = int_to_ptr.vmem [resolvable:$true] %s167_s8 }
  0x16   : > { %s1065_s10 = scalar_lea.sflag [#allocation3], %s153_s28  ;;  %s843_s11 = scalar_lea.hbm %s1054_s6, 1024 }
  0x17   : > { %p844_p2 = scmp.ne.s32.totalorder %s1054_s6, %s843_s11  ;;  %p845_p3 = pneg %p1060_p0 }
  0x18   : > { %s848_s21 = scalar_lea.hbm %s1187_s0, 2048  ;;  %p849_p4 = scmp.lt.u32.totalorder %s1054_s6, %s1187_s0 }
  0x19   : > { %p846_p5 = pnand %p845_p3, %p844_p2  ;;  %p850_p7 = scmp.lt.u32.totalorder %s848_s21, %s843_s11 }
  0x1a   : > { %p852_p13 = scmp.lt.u32.totalorder %s843_s11, %s1054_s6 }
  0x1b   : > { %p847_p6 = pneg %p846_p5  ;;  %p851_p10 = por %p850_p7, %p849_p4 }
  0x1d   : > { %p853_p12 = por %p852_p13, %p851_p10 }
  0x1f   : > { %p854_p1 = pnand %p853_p12, %p847_p6 }
  0x21   : > { %857 = shalt.err (!%p854_p1)
}
  0x22   : > { %s858_s28 = scalar_lea.vmem %s1056_s8, 1024  ;;  %s957_s29 = smov [#allocation2]  }
  0x23   : > { %p859_p2 = scmp.ne.s32.totalorder %s1056_s8, %s858_s28  ;;  %s863_s30 = sshll.u32 %s957_s29, 4  ;;  %s864_s30 = int_to_ptr.vmem [resolvable:$false] %s863_s30 }
  0x24   : > { %s865_s4 = scalar_lea.vmem %s864_s30, 2048  ;;  %p866_p9 = scmp.lt.s32.totalorder %s1056_s8, %s864_s30 }
  0x25   : > { %p861_p5 = pnand %p859_p2, %p845_p3  ;;  %p867_p4 = scmp.lt.s32.totalorder %s865_s4, %s858_s28 }
  0x27   : > { %p862_p11 = pneg %p861_p5  ;;  %p868_p7 = por %p867_p4, %p866_p9 }
  0x29   : > { %p869_p10 = pnand %p868_p7, %p862_p11 }
  0x2b   : > { %872 = shalt.err (!%p869_p10)
}
  0x2c   : > { %s958_s5 = smov 128   ;;  %s959_s7 = smov 8  }
  0x2d   : > { %781 = dma.hbm_to_vmem [thread:$0]  (!%p1060_p0), %s1054_s6, 1024, %s1056_s8, %s1065_s10, %s958_s5, %s958_s5, %s959_s7  }
  0x2e   : > { %p175_p12 = scmp.lt.s32.totalorder %s955_s17, 3  ;;  %p1197_p1 = scmp.ge.s32.totalorder %s955_s17, 1 }
  0x30   : > { %p176_p3 = pnand %p1197_p1, %p175_p12 }
  0x31   : > { %s1097_s11 = sand.u32 (!%p176_p3), 1, %s939_s13  }
  0x32   : > { %179 = sbr.rel (%p176_p3) target bundleno = 519 (0x207), region = 32  ;;  %s692_s18 = sshll.u32 (!%p176_p3), %s1097_s11, 6 }
  0x33   : > { %s182_s19 = scalar_lea.sflag (!%p176_p3), [#allocation3], %s1097_s11  ;;  %s185_s21 = scalar_lea.vmem (!%p176_p3), [#allocation2], %s692_s18 }
  0x39   : > { %926 = dma.done.wait (%p1032_p8), %s182_s19, 1024  }
  0x3a   : > { %928 = vsyncadd (%p1032_p8), %s182_s19, 4294966272  ;;  %v960_v0 = vmov 0.0   ;;  %vm961_vm0 = vmmov 0   ;;  %v842_v1 = vld [vmem:[%s1189_s2] sm:$0xff]   ;;  %v212_v3 = vld [vmem:[%s185_s21 + $0x8] sm:$0xff]  ;;  %vm231_vm1 = vcmask 130048  }
  0x3b   : > { %726 = vmatprep.subr.bf16.mxu0 %v960_v0  ;;  %732 = vmatprep.subr.bf16.mxu1 %v960_v0  ;;  %v211_v2 = vld [vmem:[%s185_s21] sm:$0xff]  ;;  %v213_v4 = vld [vmem:[%s185_s21 + $0x10] sm:$0xff]  ;;  %v214_v6 = vld [vmem:[%s185_s21 + $0x18] sm:$0xff]  ;;  %s693_s10 = sshll.u32 %s1097_s11, 5  ;;  %vm576_vm2 = vcmask 64512   ;;  %s709_s28 = sshll.u32 %s947_s15, 9 }
  0x3c   : > { %728 = vmatprep.mubr.msk.bf16.mxu0 %vm961_vm0, %v960_v0  ;;  %734 = vmatprep.mubr.msk.bf16.mxu1 %vm961_vm0, %v960_v0  ;;  %v219_v5 = vpack.c.bf16 %v212_v3, %v211_v2  ;;  %v220_v7 = vpack.c.bf16 %v214_v6, %v213_v4  ;;  %v215_v8 = vld [vmem:[%s185_s21 + $0x20] sm:$0xff]  ;;  %v216_v9 = vld [vmem:[%s185_s21 + $0x28] sm:$0xff]  ;;  %v217_v10 = vld [vmem:[%s185_s21 + $0x30] sm:$0xff]  ;;  %s207_s22 = scalar_lea.vmem [#allocation5], %s693_s10  ;;  %s1136_s4 = scalar_lea.hbm %s1190_s3, %s709_s28 }
  0x3d   : > { %727 = vmatpush3.bf16.msra.mxu0 %v842_v1  ;;  %733 = vmatpush3.bf16.msra.mxu1 %v842_v1  ;;  %v218_v11 = vld [vmem:[%s185_s21 + $0x38] sm:$0xff]  ;;  %v221_v12 = vpack.c.bf16 %v216_v9, %v215_v8  ;;  %v408_v24 = vld [vmem:[%s1188_s1] sm:$0xf]  ;;  %s597_s23 = sshll.u32 %s207_s22, 4  ;;  %s582_s15 = scalar_lea.sflag [#allocation4], %s1097_s11  ;;  %s1131_s23 = int_to_ptr.vmem [resolvable:$true] %s597_s23 }
  0x3e   : > { %738 = vmatprep.subr.bf16.mxu0 %v960_v0  ;;  %744 = vmatprep.subr.bf16.mxu1 %v960_v0  ;;  %v222_v13 = vpack.c.bf16 %v218_v11, %v217_v10  ;;  %s873_s5 = scalar_lea.vmem %s1131_s23, 512  ;;  %p1198_p9 = scmp.ne.s32.totalorder %s1194_s25, 0 }
  0x3f   : > { %p874_p8 = scmp.ne.s32.totalorder %s1131_s23, %s873_s5  ;;  %s962_s7 = smov [#allocation5]  }
  0x40   : > { %729 = vmatmul.mubr.msk.bf16.vlgmr.msra.gmra.mrb[0].mxu0 %vm231_vm1, %v219_v5  ;;  %735 = vmatmul.mubr.msk.bf16.vlgmr.msra.gmra.mrb[0].mxu1 %vm231_vm1, %v220_v7  ;;  %s877_s18 = sshll.u32 %s962_s7, 4  ;;  %s878_s18 = int_to_ptr.vmem [resolvable:$false] %s877_s18 }
  0x41   : > { %739 = vmatpush3.bf16.msra.mxu0 %v842_v1  ;;  %745 = vmatpush3.bf16.msra.mxu1 %v842_v1  ;;  %p875_p11 = pnand %p874_p8, %p1198_p9  ;;  %s879_s19 = scalar_lea.vmem %s878_s18, 1024 }
  0x42   : > { %740 = vmatprep.mubr.msk.bf16.mxu0 %vm961_vm0, %v960_v0  ;;  %746 = vmatprep.mubr.msk.bf16.mxu1 %vm961_vm0, %v960_v0  ;;  %p880_p6 = scmp.lt.s32.totalorder %s1131_s23, %s878_s18  ;;  %p881_p13 = scmp.lt.s32.totalorder %s879_s19, %s873_s5 }
  0x43   : > { %750 = vmatprep.subr.bf16.mxu0 %v960_v0  ;;  %756 = vmatprep.subr.bf16.mxu1 %v960_v0  ;;  %p876_p0 = pneg %p875_p11 }
  0x44   : > { %p882_p2 = por %p881_p13, %p880_p6 }
  0x46   : > { %p883_p5 = pnand %p882_p2, %p876_p0 }
  0x48   : > { %741 = vmatmul.mubr.msk.bf16.vlgmr.msra.gmra.mrb[4].mxu0 %vm231_vm1, %v221_v12  ;;  %747 = vmatmul.mubr.msk.bf16.vlgmr.msra.gmra.mrb[4].mxu1 %vm231_vm1, %v222_v13 }
  0x49   : > { %752 = vmatprep.mubr.msk.bf16.mxu0 %vm961_vm0, %v960_v0  ;;  %758 = vmatprep.mubr.msk.bf16.mxu1 %vm961_vm0, %v960_v0 }
 0x113   : > { %v269_v14 = vpop.f32.mrb[0].mxu0  ;;  %v313_v15 = vpop.f32.mrb[0].mxu1 }
 0x114   : > { %v730_v16 = vpop.f32.mrb[1].mxu0  ;;  %v736_v17 = vpop.f32.mrb[1].mxu1 }
 0x115   : > { %v272_v18 = vpop.f32.mrb[2].mxu0  ;;  %v316_v19 = vpop.f32.mrb[2].mxu1 }
 0x116   : > { %v409_v20 = vpack.c.bf16 %v272_v18, %v269_v14  ;;  %v410_v21 = vpack.c.bf16 %v316_v19, %v313_v15  ;;  %v731_v22 = vpop.f32.mrb[3].mxu0  ;;  %v737_v23 = vpop.f32.mrb[3].mxu1 }
 0x118   : > { %751 = vmatpush3.bf16.msra.mxu0 %v409_v20  ;;  %757 = vmatpush3.bf16.msra.mxu1 %v410_v21 }
 0x119   : > { %762 = vmatprep.subr.bf16.mxu0 %v960_v0  ;;  %768 = vmatprep.subr.bf16.mxu1 %v960_v0 }
 0x11b   : > { %v357_v25 = vpop.f32.mrb[4].mxu0  ;;  %v401_v26 = vpop.f32.mrb[4].mxu1  ;;  %753 = vmatmul.mubr.msk.bf16.vlgmr.msra.gmra.mrb[8].mxu0 %vm231_vm1, %v408_v24  ;;  %759 = vmatmul.mubr.msk.bf16.vlgmr.msra.gmra.mrb[8].mxu1 %vm231_vm1, %v408_v24 }
 0x11c   : > { %v742_v27 = vpop.f32.mrb[5].mxu0  ;;  %v748_v28 = vpop.f32.mrb[5].mxu1  ;;  %764 = vmatprep.mubr.msk.bf16.mxu0 %vm961_vm0, %v960_v0  ;;  %770 = vmatprep.mubr.msk.bf16.mxu1 %vm961_vm0, %v960_v0 }
 0x11d   : > { %v360_v29 = vpop.f32.mrb[6].mxu0  ;;  %v404_v30 = vpop.f32.mrb[6].mxu1 }
 0x11e   : > { %v411_v31 = vpack.c.bf16 %v360_v29, %v357_v25  ;;  %v412_v32 = vpack.c.bf16 %v404_v30, %v401_v26  ;;  %v743_v33 = vpop.f32.mrb[7].mxu0  ;;  %v749_v34 = vpop.f32.mrb[7].mxu1 }
 0x120   : > { %763 = vmatpush3.bf16.msra.mxu0 %v411_v31  ;;  %769 = vmatpush3.bf16.msra.mxu1 %v412_v32 }
 0x123   : > { %765 = vmatmul.mubr.msk.bf16.vlgmr.msra.gmra.mrb[12].mxu0 %vm231_vm1, %v408_v24  ;;  %771 = vmatmul.mubr.msk.bf16.vlgmr.msra.gmra.mrb[12].mxu1 %vm231_vm1, %v408_v24 }
 0x1ee   : > { %v450_v35 = vpop.f32.mrb[8].mxu0  ;;  %v490_v36 = vpop.f32.mrb[8].mxu1 }
 0x1ef   : > { %577 = vst.msk [vmem:[%s207_s22] sm:$0xff] %vm576_vm2, %v450_v35  ;;  %578 = vst.msk [vmem:[%s207_s22 + $0x8] sm:$0xff] %vm576_vm2, %v490_v36  ;;  %v754_v37 = vpop.f32.mrb[9].mxu0  ;;  %v760_v38 = vpop.f32.mrb[9].mxu1 }
 0x1f0   : > { %v453_v39 = vpop.f32.mrb[10].mxu0  ;;  %v493_v40 = vpop.f32.mrb[10].mxu1 }
 0x1f1   : > { %v755_v41 = vpop.f32.mrb[11].mxu0  ;;  %v761_v42 = vpop.f32.mrb[11].mxu1 }
 0x1f6   : > { %v530_v43 = vpop.f32.mrb[12].mxu0  ;;  %v570_v44 = vpop.f32.mrb[12].mxu1 }
 0x1f7   : > { %579 = vst.msk [vmem:[%s207_s22 + $0x10] sm:$0xff] %vm576_vm2, %v530_v43  ;;  %580 = vst.msk [vmem:[%s207_s22 + $0x18] sm:$0xff] %vm576_vm2, %v570_v44  ;;  %v766_v45 = vpop.f32.mrb[13].mxu0  ;;  %v772_v46 = vpop.f32.mrb[13].mxu1 }
 0x1f8   : > { %v533_v47 = vpop.f32.mrb[14].mxu0  ;;  %v573_v48 = vpop.f32.mrb[14].mxu1 }
 0x1f9   : > { %886 = shalt.err (!%p883_p5)
}
 0x1fa   : > { %s887_s21 = scalar_lea.hbm %s1136_s4, 512  ;;  %s891_s24 = scalar_lea.hbm %s1190_s3, 1024 }
 0x1fb   : > { %p888_p4 = scmp.ne.s32.totalorder %s1136_s4, %s887_s21  ;;  %p892_p12 = scmp.lt.u32.totalorder %s1136_s4, %s1190_s3 }
 0x1fc   : > { %p893_p1 = scmp.lt.u32.totalorder %s891_s24, %s887_s21  ;;  %p895_p8 = scmp.lt.u32.totalorder %s887_s21, %s1136_s4 }
 0x1fd   : > { %p889_p7 = pnand %p888_p4, %p1198_p9 }
 0x1fe   : > { %p894_p3 = por %p893_p1, %p892_p12 }
 0x1ff   : > { %p890_p10 = pneg %p889_p7 }
 0x200   : > { %p896_p11 = por %p895_p8, %p894_p3 }
 0x202   : > { %p897_p0 = pnand %p896_p11, %p890_p10 }
 0x204   : > { %900 = shalt.err (!%p897_p0)
}
 0x205   : > { %s963_s22 = smov 128   ;;  %s964_s28 = smov 8   ;;  %v767_v49 = vpop.f32.mrb[15].mxu0  ;;  %v773_v50 = vpop.f32.mrb[15].mxu1 }
 0x206   : > { %776 = dma.vmem_to_hbm [thread:$0]  (%p1198_p9), %s1131_s23, 512, %s1136_s4, %s582_s15, %s963_s22, %s963_s22, %s964_s28  }
 0x207 PF: > { %s612_s29 = sand.u32 1, %s935_s12   ;;  %p1199_p6 = scmp.ne.s32.totalorder %s1195_s27, 0 }
 0x208   : > { %p1200_p13 = scmp.ge.s32.totalorder %s955_s17, 2  ;;  %s613_s30 = scalar_lea.sflag [#allocation4], %s612_s29 }
 0x20a   : > { %p783_p2 = pnand %p1200_p13, %p1199_p6 }
 0x20c   : > { %930 = dma.done.wait (!%p783_p2), %s613_s30, 512  }
 0x20d   : > { %932 = vsyncadd (!%p783_p2), %s613_s30, 4294966784  ;;  %s19_s17 = sadd.s32 1, %s955_s17   ;;  %s1201_s12 = smov %s939_s13 }
 0x20e   : > { %p16_p5 = scmp.ge.s32.totalorder %s19_s17, 4   ;;  %s1202_s13 = smov %s943_s14 }
 0x20f   : > { %s1203_s14 = smov %s1041_s26  ;;  %s1204_s15 = smov %s951_s16 }
 0x210   : > { %s1205_s16 = smov %s1207_s20  ;;  %18 = sbr.rel (!%p16_p5) target bundleno = 6 (0x6), region = 77 }
 0x217   :  { %618 = vsyncpa [#allocation3], 1 }
 0x218   :  { %620 = vsyncpa [#allocation3 + $0x1], 1 }
 0x219   :  { %621 = vsyncpa [#allocation4], 1 }
 0x21a   :  { %623 = vsyncpa [#allocation4 + $0x1], 1 }

</bundles_post_ra>
